<compile_context>
chip_gen: v5e
topology: v5e:2x2
jax: 0.10.0
libtpu: 0.0.40
codegen_flags: <defaults>
</compile_context>

<pallas_src>
import math
import numpy as np
import jax
import jax.numpy as jnp
from jax.experimental import pallas as pl
from jax.experimental.pallas import tpu as pltpu


# ----------------------------- Pallas kernel --------------------------------

def carousel_kernel(len_ref, enc_ref, feat_ref, wkv_ref, wqo_ref, b_ref, out_ref):
    enc = enc_ref[...]                                   # (N, H) f32
    N, H = enc.shape

    b = b_ref[...]                                       # (1, 4H) = [b_kv | bq' | bo]
    b_kv = b[:, :2 * H]
    bq = b[:, 2 * H:3 * H]                               # already scaled by 1/sqrt(H)
    bo = b[:, 3 * H:]

    wqo = wqo_ref[...]                                   # (H, 2H) = [Wq' | Wo]
    wq = wqo[:, :H]
    wo = wqo[:, H:]

    # query projection (1-head MHA; 1/sqrt(H) scale folded into wq/bq on host)
    q = jnp.dot(enc, wq, preferred_element_type=jnp.float32) + bq          # (N, H)

    # fused carousel_embed_net + K/V projection for all 3 slots in one matmul
    kv = jnp.dot(feat_ref[...], wkv_ref[...],
                 preferred_element_type=jnp.float32) + b_kv                # (3N, 2H)

    lens = len_ref[...]                                  # (N, 1) int32

    scores, values = [], []
    for j in range(3):                                   # carousel seq length is exactly 3
        kvj = kv[j * N:(j + 1) * N, :]                   # (N, 2H) static sublane slice
        k = kvj[:, :H]
        v = kvj[:, H:]
        s = jnp.sum(q * k, axis=-1, keepdims=True)       # (N, 1) per-row dot (XLU)
        # key_padding_mask: slot j is masked iff j >= carousel_len
        s = jnp.where(lens > j, s, jnp.float32(-1e30))
        scores.append(s)
        values.append(v)

    # softmax over the 3 key slots
    m = jnp.maximum(jnp.maximum(scores[0], scores[1]), scores[2])
    p = [jnp.exp(s - m) for s in scores]
    denom = p[0] + p[1] + p[2]
    inv = 1.0 / denom
    attn = (p[0] * values[0] + p[1] * values[1] + p[2] * values[2]) * inv  # (N, H)

    out_attn = jnp.dot(attn, wo, preferred_element_type=jnp.float32) + bo  # (N, H)

    # store the two halves directly (no lane-axis concatenate)
    out_ref[:, 0:H] = out_attn
    out_ref[:, H:] = enc


# ------------------------ host-side weight preparation -----------------------

def prepare_packed_weights(weights, H):
    """Fuse embed Linear into K/V, fold 1/sqrt(H) into Q, pack into 3 arrays."""
    W_emb, b_emb, Wq, bq, Wk, bk, Wv, bv, Wo, bo = weights
    scale = jnp.float32(1.0 / math.sqrt(H))
    # exact algebraic fusion: k = (f @ W_emb + b_emb) @ Wk + bk = f @ Wk' + bk'
    Wk_f = W_emb @ Wk
    bk_f = b_emb @ Wk + bk
    Wv_f = W_emb @ Wv
    bv_f = b_emb @ Wv + bv
    W_kv = jnp.concatenate([Wk_f, Wv_f], axis=1)                 # (AW, 2H)
    W_qo = jnp.concatenate([Wq * scale, Wo], axis=1)             # (H, 2H)
    b_all = jnp.concatenate([bk_f, bv_f, bq * scale, bo], axis=1)  # (1, 4H)
    return W_kv, W_qo, b_all


def carousel_embed_forward(carousel_len, encoder_state, carousel_features, weights):
    """carousel_features: (3, N, A+W); weights pre-transposed to (in, out)."""
    N, H = encoder_state.shape
    AW = carousel_features.shape[-1]

    feat_flat = carousel_features.reshape(3 * N, AW)             # (3N, AW)
    W_kv, W_qo, b_all = prepare_packed_weights(weights, H)

    full = lambda i: (0, 0)
    in_specs = [
        pl.BlockSpec((N, 1), full),              # carousel_len
        pl.BlockSpec((N, H), full),              # encoder_state
        pl.BlockSpec((3 * N, AW), full),         # flattened carousel features
        pl.BlockSpec((AW, 2 * H), full),         # fused K/V weight
        pl.BlockSpec((H, 2 * H), full),          # packed Q/O weight
        pl.BlockSpec((1, 4 * H), full),          # packed biases
    ]
    out_specs = pl.BlockSpec((N, 2 * H), full)

    return pl.pallas_call(
        carousel_kernel,
        out_shape=jax.ShapeDtypeStruct((N, 2 * H), jnp.float32),
        grid_spec=pltpu.PrefetchScalarGridSpec(
            num_scalar_prefetch=0,
            grid=(1,),                            # whole problem in one step
            in_specs=in_specs,
            out_specs=out_specs,
        ),
        compiler_params=pltpu.CompilerParams(dimension_semantics=("arbitrary",)),
    )(carousel_len, encoder_state, feat_flat, W_kv, W_qo, b_all)


# ----------------------- host-side glue (dict walking) ----------------------
# TODO(synk): the per-round dict walking below is data-dependent host code with
# no Pallas equivalent; it is reproduced in numpy as in the PyTorch module.

POSITIONS = ['left', 'center', 'right', 'focus', 'empty']


def build_carousel_inputs(carousel_state, carousel_pos, asset_feature_size,
                          batch_size, num_rounds):
    """Reproduces _setup_occupancy_states + the per-round feature assembly loop."""
    zero = np.zeros((asset_feature_size,), np.float32)
    occupancy_states, occupancy_embeds = {}, {}
    for n in range(4):
        states = [carousel_pos[POSITIONS[i]] for i in range(n)] \
               + [carousel_pos['empty'] for _ in range(3 - n)]
        occupancy_states[n] = np.stack(states, 0)
        occupancy_embeds[n] = [np.stack([zero] * (3 - n), 0)] if (3 - n) > 0 else []
    empty_feature = np.concatenate([zero, carousel_pos['empty']])[None]     # (1, A+W)
    none_features = np.broadcast_to(empty_feature, (3, empty_feature.shape[-1]))

    feats, sizes = [], []
    for b in range(batch_size):
        for r in range(num_rounds):
            d = carousel_state[b][r]
            if d is None:
                f = none_features
                sizes.append(1)
            elif 'focus' in d:
                f0 = np.concatenate([d['focus'], carousel_pos['focus']])[None]
                f = np.concatenate([f0, empty_feature, empty_feature], 0)
                sizes.append(1)
            else:
                cs = len(d['carousel'])
                if cs < 3:
                    all_emb = np.concatenate([d['carousel']] + occupancy_embeds[cs], 0)
                else:
                    all_emb = d['carousel']
                f = np.concatenate([all_emb, occupancy_states[cs]], -1)
                sizes.append(cs)
            feats.append(np.asarray(f, np.float32))
    carousel_features = np.stack(feats, 0)                                  # (N, 3, A+W)
    carousel_features = np.transpose(carousel_features, (1, 0, 2))          # (3, N, A+W)
    carousel_len = np.asarray(sizes, np.int32).reshape(-1, 1)               # (N, 1)
    return carousel_features, carousel_len


def reference_forward(carousel_len, encoder_state, carousel_features, weights):
    """Pure-JAX reference of the same math (Linear + 1-head MHA + concat)."""
    W_emb, b_emb, Wq, bq, Wk, bk, Wv, bv, Wo, bo = weights
    H = encoder_state.shape[-1]
    emb = jnp.einsum('jnf,fh->jnh', carousel_features, W_emb) + b_emb       # (3, N, H)
    q = (encoder_state @ Wq + bq) * (1.0 / math.sqrt(H))                    # (N, H)
    k = jnp.einsum('jnh,hd->jnd', emb, Wk) + bk
    v = jnp.einsum('jnh,hd->jnd', emb, Wv) + bv
    s = jnp.einsum('nd,jnd->nj', q, k)                                      # (N, 3)
    mask = jnp.arange(3)[None, :] >= carousel_len                           # (N, 3) True=masked
    s = jnp.where(mask, jnp.float32(-1e30), s)
    p = jax.nn.softmax(s, axis=-1)
    attn = jnp.einsum('nj,jnd->nd', p, v)
    out = attn @ Wo + bo
    return jnp.concatenate([out, encoder_state], axis=-1)


# ---------------------------------- main -------------------------------------

if __name__ == "__main__":
    A = 32            # asset_feature_size
    W = 32            # word_embed_size
    H = 32            # hidden_size (text_encoder == 'lstm')
    batch_size, num_rounds = 2, 8
    N = batch_size * num_rounds

    key = jax.random.PRNGKey(0)
    keys = jax.random.split(key, 32)

    # positional parameters (registered nn.Parameters in __init__)
    carousel_pos = {
        pos: np.asarray(jax.random.normal(keys[i], (W,), jnp.float32))
        for i, pos in enumerate(POSITIONS)
    }

    # carousel_embed_net: Linear(A+W -> H); MHA in/out projections (1 head, dim H)
    def pmat(k, shape, scale=0.08):
        return scale * jax.random.normal(k, shape, jnp.float32)

    W_emb = pmat(keys[5], (A + W, H));  b_emb = pmat(keys[6], (1, H))
    Wq = pmat(keys[7], (H, H));         bq = pmat(keys[8], (1, H))
    Wk = pmat(keys[9], (H, H));         bk = pmat(keys[10], (1, H))
    Wv = pmat(keys[11], (H, H));        bv = pmat(keys[12], (1, H))
    Wo = pmat(keys[13], (H, H));        bo = pmat(keys[14], (1, H))
    weights = (W_emb, b_emb, Wq, bq, Wk, bk, Wv, bv, Wo, bo)

    # synthetic carousel_state: cycle through {None, focus, carousel of size 1/2/3}
    item_keys = jax.random.split(keys[15], N)
    carousel_state = []
    idx = 0
    for b in range(batch_size):
        rounds = []
        for r in range(num_rounds):
            case = idx % 5
            ik = item_keys[idx]
            if case == 0:
                rounds.append(None)
            elif case == 1:
                rounds.append({'focus': np.asarray(jax.random.normal(ik, (A,), jnp.float32))})
            else:
                cs = case - 1  # 1, 2 or 3 carousel items
                rounds.append({'carousel': np.asarray(
                    jax.random.normal(ik, (cs, A), jnp.float32))})
            idx += 1
        carousel_state.append(rounds)

    encoder_state = jax.random.normal(keys[16], (N, H), jnp.float32)

    carousel_features_np, carousel_len_np = build_carousel_inputs(
        carousel_state, carousel_pos, A, batch_size, num_rounds)
    carousel_features = jnp.asarray(carousel_features_np)
    carousel_len = jnp.asarray(carousel_len_np)

    out = carousel_embed_forward(carousel_len, encoder_state, carousel_features, weights)
    out = jax.block_until_ready(out)

    ref = reference_forward(carousel_len, encoder_state, carousel_features, weights)
    np.testing.assert_allclose(np.asarray(out), np.asarray(ref), rtol=1e-3, atol=1e-3)

    print("KERNEL_OK")
</pallas_src>

<mosaic_0001>
module attributes {stable_mosaic.version = 11 : i64} {
  func.func @carousel_kernel(%arg0: i32, %arg1: memref<16x1xi32, #tpu.memory_space<vmem>>, %arg2: memref<16x32xf32, #tpu.memory_space<vmem>>, %arg3: memref<48x64xf32, #tpu.memory_space<vmem>>, %arg4: memref<64x64xf32, #tpu.memory_space<vmem>>, %arg5: memref<32x64xf32, #tpu.memory_space<vmem>>, %arg6: memref<1x128xf32, #tpu.memory_space<vmem>>, %arg7: memref<16x64xf32, #tpu.memory_space<vmem>>) attributes {dimension_semantics = [#tpu.dimension_semantics<arbitrary>], iteration_bounds = array<i64: 1>, scalar_prefetch = 0 : i64, scratch_operands = 0 : i64, tpu.core_type = #tpu.core_type<tc>, window_params = [{pipeline_mode = #tpu.pipeline_mode<synchronous>, transform_indices = @transform_0, window_bounds = array<i64: 16, 1>}, {pipeline_mode = #tpu.pipeline_mode<synchronous>, transform_indices = @transform_1, window_bounds = array<i64: 16, 32>}, {pipeline_mode = #tpu.pipeline_mode<synchronous>, transform_indices = @transform_2, window_bounds = array<i64: 48, 64>}, {pipeline_mode = #tpu.pipeline_mode<synchronous>, transform_indices = @transform_3, window_bounds = array<i64: 64, 64>}, {pipeline_mode = #tpu.pipeline_mode<synchronous>, transform_indices = @transform_4, window_bounds = array<i64: 32, 64>}, {pipeline_mode = #tpu.pipeline_mode<synchronous>, transform_indices = @transform_5, window_bounds = array<i64: 1, 128>}, {pipeline_mode = #tpu.pipeline_mode<synchronous>, transform_indices = @transform_6, window_bounds = array<i64: 16, 64>}]} {
    %c0 = arith.constant 0 : index
    %c0_0 = arith.constant 0 : index
    %0 = vector.load %arg2[%c0, %c0_0] : memref<16x32xf32, #tpu.memory_space<vmem>>, vector<16x32xf32>
    %c0_1 = arith.constant 0 : index
    %c0_2 = arith.constant 0 : index
    %1 = vector.load %arg6[%c0_1, %c0_2] : memref<1x128xf32, #tpu.memory_space<vmem>>, vector<1x128xf32>
    %2 = vector.extract_strided_slice %1 {offsets = [0, 0], sizes = [1, 64], strides = [1, 1]} : vector<1x128xf32> to vector<1x64xf32>
    %3 = vector.extract_strided_slice %1 {offsets = [0, 64], sizes = [1, 32], strides = [1, 1]} : vector<1x128xf32> to vector<1x32xf32>
    %4 = vector.extract_strided_slice %1 {offsets = [0, 96], sizes = [1, 32], strides = [1, 1]} : vector<1x128xf32> to vector<1x32xf32>
    %c0_3 = arith.constant 0 : index
    %c0_4 = arith.constant 0 : index
    %5 = vector.load %arg5[%c0_3, %c0_4] : memref<32x64xf32, #tpu.memory_space<vmem>>, vector<32x64xf32>
    %6 = vector.extract_strided_slice %5 {offsets = [0, 0], sizes = [32, 32], strides = [1, 1]} : vector<32x64xf32> to vector<32x32xf32>
    %7 = vector.extract_strided_slice %5 {offsets = [0, 32], sizes = [32, 32], strides = [1, 1]} : vector<32x64xf32> to vector<32x32xf32>
    %cst = arith.constant dense<0.000000e+00> : vector<16x32xf32>
    %8 = tpu.matmul %0, %6, %cst {dimension_numbers = #tpu.dot_dimension_numbers<[1], [0], [0], [1], [0, 0, 1, 1], [], []>} : vector<16x32xf32>, vector<32x32xf32>, vector<16x32xf32> -> vector<16x32xf32>
    %9 = vector.broadcast %3 : vector<1x32xf32> to vector<16x32xf32>
    %10 = arith.addf %8, %9 : vector<16x32xf32>
    %c0_5 = arith.constant 0 : index
    %c0_6 = arith.constant 0 : index
    %11 = vector.load %arg3[%c0_5, %c0_6] : memref<48x64xf32, #tpu.memory_space<vmem>>, vector<48x64xf32>
    %c0_7 = arith.constant 0 : index
    %c0_8 = arith.constant 0 : index
    %12 = vector.load %arg4[%c0_7, %c0_8] : memref<64x64xf32, #tpu.memory_space<vmem>>, vector<64x64xf32>
    %cst_9 = arith.constant dense<0.000000e+00> : vector<48x64xf32>
    %13 = tpu.matmul %11, %12, %cst_9 {dimension_numbers = #tpu.dot_dimension_numbers<[1], [0], [0], [1], [0, 0, 1, 1], [], []>} : vector<48x64xf32>, vector<64x64xf32>, vector<48x64xf32> -> vector<48x64xf32>
    %14 = vector.broadcast %2 : vector<1x64xf32> to vector<48x64xf32>
    %15 = arith.addf %13, %14 : vector<48x64xf32>
    %c0_10 = arith.constant 0 : index
    %c0_11 = arith.constant 0 : index
    %16 = vector.load %arg1[%c0_10, %c0_11] : memref<16x1xi32, #tpu.memory_space<vmem>>, vector<16x1xi32>
    %17 = vector.extract_strided_slice %15 {offsets = [0, 0], sizes = [16, 64], strides = [1, 1]} : vector<48x64xf32> to vector<16x64xf32>
    %18 = vector.extract_strided_slice %17 {offsets = [0, 0], sizes = [16, 32], strides = [1, 1]} : vector<16x64xf32> to vector<16x32xf32>
    %19 = vector.extract_strided_slice %17 {offsets = [0, 32], sizes = [16, 32], strides = [1, 1]} : vector<16x64xf32> to vector<16x32xf32>
    %20 = arith.mulf %10, %18 : vector<16x32xf32>
    %cst_12 = arith.constant dense<0.000000e+00> : vector<16xf32>
    %21 = vector.multi_reduction <add>, %20, %cst_12 [1] : vector<16x32xf32> to vector<16xf32>
    %22 = vector.shape_cast %21 : vector<16xf32> to vector<16x1xf32>
    %c0_i32 = arith.constant 0 : i32
    %23 = vector.broadcast %c0_i32 : i32 to vector<16x1xi32>
    %24 = arith.cmpi sgt, %16, %23 : vector<16x1xi32>
    %cst_13 = arith.constant -1.000000e+30 : f32
    %25 = vector.broadcast %cst_13 : f32 to vector<16x1xf32>
    %26 = arith.select %24, %22, %25 : vector<16x1xi1>, vector<16x1xf32>
    %27 = vector.extract_strided_slice %15 {offsets = [16, 0], sizes = [16, 64], strides = [1, 1]} : vector<48x64xf32> to vector<16x64xf32>
    %28 = vector.extract_strided_slice %27 {offsets = [0, 0], sizes = [16, 32], strides = [1, 1]} : vector<16x64xf32> to vector<16x32xf32>
    %29 = vector.extract_strided_slice %27 {offsets = [0, 32], sizes = [16, 32], strides = [1, 1]} : vector<16x64xf32> to vector<16x32xf32>
    %30 = arith.mulf %10, %28 : vector<16x32xf32>
    %cst_14 = arith.constant dense<0.000000e+00> : vector<16xf32>
    %31 = vector.multi_reduction <add>, %30, %cst_14 [1] : vector<16x32xf32> to vector<16xf32>
    %32 = vector.shape_cast %31 : vector<16xf32> to vector<16x1xf32>
    %c1_i32 = arith.constant 1 : i32
    %33 = vector.broadcast %c1_i32 : i32 to vector<16x1xi32>
    %34 = arith.cmpi sgt, %16, %33 : vector<16x1xi32>
    %cst_15 = arith.constant -1.000000e+30 : f32
    %35 = vector.broadcast %cst_15 : f32 to vector<16x1xf32>
    %36 = arith.select %34, %32, %35 : vector<16x1xi1>, vector<16x1xf32>
    %37 = vector.extract_strided_slice %15 {offsets = [32, 0], sizes = [16, 64], strides = [1, 1]} : vector<48x64xf32> to vector<16x64xf32>
    %38 = vector.extract_strided_slice %37 {offsets = [0, 0], sizes = [16, 32], strides = [1, 1]} : vector<16x64xf32> to vector<16x32xf32>
    %39 = vector.extract_strided_slice %37 {offsets = [0, 32], sizes = [16, 32], strides = [1, 1]} : vector<16x64xf32> to vector<16x32xf32>
    %40 = arith.mulf %10, %38 : vector<16x32xf32>
    %cst_16 = arith.constant dense<0.000000e+00> : vector<16xf32>
    %41 = vector.multi_reduction <add>, %40, %cst_16 [1] : vector<16x32xf32> to vector<16xf32>
    %42 = vector.shape_cast %41 : vector<16xf32> to vector<16x1xf32>
    %c2_i32 = arith.constant 2 : i32
    %43 = vector.broadcast %c2_i32 : i32 to vector<16x1xi32>
    %44 = arith.cmpi sgt, %16, %43 : vector<16x1xi32>
    %cst_17 = arith.constant -1.000000e+30 : f32
    %45 = vector.broadcast %cst_17 : f32 to vector<16x1xf32>
    %46 = arith.select %44, %42, %45 : vector<16x1xi1>, vector<16x1xf32>
    %47 = arith.maximumf %26, %36 : vector<16x1xf32>
    %48 = arith.maximumf %47, %46 : vector<16x1xf32>
    %49 = arith.subf %26, %48 : vector<16x1xf32>
    %50 = math.exp %49 : vector<16x1xf32>
    %51 = arith.subf %36, %48 : vector<16x1xf32>
    %52 = math.exp %51 : vector<16x1xf32>
    %53 = arith.subf %46, %48 : vector<16x1xf32>
    %54 = math.exp %53 : vector<16x1xf32>
    %55 = arith.addf %50, %52 : vector<16x1xf32>
    %56 = arith.addf %55, %54 : vector<16x1xf32>
    %cst_18 = arith.constant 1.000000e+00 : f32
    %57 = vector.broadcast %cst_18 : f32 to vector<16x1xf32>
    %58 = arith.divf %57, %56 : vector<16x1xf32>
    %59 = vector.broadcast %50 : vector<16x1xf32> to vector<16x32xf32>
    %60 = arith.mulf %59, %19 : vector<16x32xf32>
    %61 = vector.broadcast %52 : vector<16x1xf32> to vector<16x32xf32>
    %62 = arith.mulf %61, %29 : vector<16x32xf32>
    %63 = arith.addf %60, %62 : vector<16x32xf32>
    %64 = vector.broadcast %54 : vector<16x1xf32> to vector<16x32xf32>
    %65 = arith.mulf %64, %39 : vector<16x32xf32>
    %66 = arith.addf %63, %65 : vector<16x32xf32>
    %67 = vector.broadcast %58 : vector<16x1xf32> to vector<16x32xf32>
    %68 = arith.mulf %66, %67 : vector<16x32xf32>
    %cst_19 = arith.constant dense<0.000000e+00> : vector<16x32xf32>
    %69 = tpu.matmul %68, %7, %cst_19 {dimension_numbers = #tpu.dot_dimension_numbers<[1], [0], [0], [1], [0, 0, 1, 1], [], []>} : vector<16x32xf32>, vector<32x32xf32>, vector<16x32xf32> -> vector<16x32xf32>
    %70 = vector.broadcast %4 : vector<1x32xf32> to vector<16x32xf32>
    %71 = arith.addf %69, %70 : vector<16x32xf32>
    %c0_20 = arith.constant 0 : index
    %c0_21 = arith.constant 0 : index
    %72 = vector.load %arg7[%c0_20, %c0_21] : memref<16x64xf32, #tpu.memory_space<vmem>>, vector<16x32xf32>
    tpu.vector_store %arg7[%c0_20, %c0_21], %71 {strides = array<i32>} : memref<16x64xf32, #tpu.memory_space<vmem>>, vector<16x32xf32>,
    %c0_22 = arith.constant 0 : index
    %c32 = arith.constant 32 : index
    %73 = vector.load %arg7[%c0_22, %c32] : memref<16x64xf32, #tpu.memory_space<vmem>>, vector<16x32xf32>
    tpu.vector_store %arg7[%c0_22, %c32], %0 {strides = array<i32>} : memref<16x64xf32, #tpu.memory_space<vmem>>, vector<16x32xf32>,
    return
  }
  func.func @transform_0(%arg0: i32) -> (i32, i32) {
    %c0_i32 = arith.constant 0 : i32
    %c0_i32_0 = arith.constant 0 : i32
    %c0_i32_1 = arith.constant 0 : i32
    return %c0_i32, %c0_i32_0 : i32, i32
  }
  func.func @transform_1(%arg0: i32) -> (i32, i32) {
    %c0_i32 = arith.constant 0 : i32
    %c0_i32_0 = arith.constant 0 : i32
    %c0_i32_1 = arith.constant 0 : i32
    return %c0_i32, %c0_i32_0 : i32, i32
  }
  func.func @transform_2(%arg0: i32) -> (i32, i32) {
    %c0_i32 = arith.constant 0 : i32
    %c0_i32_0 = arith.constant 0 : i32
    %c0_i32_1 = arith.constant 0 : i32
    return %c0_i32, %c0_i32_0 : i32, i32
  }
  func.func @transform_3(%arg0: i32) -> (i32, i32) {
    %c0_i32 = arith.constant 0 : i32
    %c0_i32_0 = arith.constant 0 : i32
    %c0_i32_1 = arith.constant 0 : i32
    return %c0_i32, %c0_i32_0 : i32, i32
  }
  func.func @transform_4(%arg0: i32) -> (i32, i32) {
    %c0_i32 = arith.constant 0 : i32
    %c0_i32_0 = arith.constant 0 : i32
    %c0_i32_1 = arith.constant 0 : i32
    return %c0_i32, %c0_i32_0 : i32, i32
  }
  func.func @transform_5(%arg0: i32) -> (i32, i32) {
    %c0_i32 = arith.constant 0 : i32
    %c0_i32_0 = arith.constant 0 : i32
    %c0_i32_1 = arith.constant 0 : i32
    return %c0_i32, %c0_i32_0 : i32, i32
  }
  func.func @transform_6(%arg0: i32) -> (i32, i32) {
    %c0_i32 = arith.constant 0 : i32
    %c0_i32_0 = arith.constant 0 : i32
    %c0_i32_1 = arith.constant 0 : i32
    return %c0_i32, %c0_i32_0 : i32, i32
  }
}

</mosaic_0001>

<bundles_post_ra>
// kernel: tpu_custom_call.1
= control target key start
LH: loop header
LB: loop body
LE: loop exit
PB: predicated region body
PF: predicated region fallthrough
CT: control target
= control target key end

     0   :  { %11 = vsyncpa [#allocation3], 0  ;;  %s749_s0 = inlined_call_operand.vmem [shape: s32[16,1], index: 0, kind: input, shape index: {}]   ;;  %s750_s1 = inlined_call_operand.vmem [shape: f32[16,32], index: 1, kind: input, shape index: {}]   ;;  %s751_s2 = inlined_call_operand.hbm [shape: f32[48,64], index: 2, kind: input, shape index: {}]   ;;  %s752_s3 = inlined_call_operand.hbm [shape: f32[64,64], index: 3, kind: input, shape index: {}]   ;;  %s753_s4 = inlined_call_operand.hbm [shape: f32[32,64], index: 4, kind: input, shape index: {}]   ;;  %s754_s5 = inlined_call_operand.vmem [shape: f32[1,128], index: 5, kind: input, shape index: {}]   ;;  %s755_s6 = inlined_call_operand.hbm [shape: f32[16,64], index: 6, kind: output, shape index: {}]  }
   0x1   :  { %12 = vsyncpa [#allocation6], 0 }
   0x2   :  { %13 = vsyncpa [#allocation4], 0  ;;  %s35_s23 = sshll.u32 %s752_s3, 4  ;;  %s579_s24 = smov [#allocation5]   ;;  %s36_s23 = int_to_ptr.hbm [resolvable:$true] %s35_s23 }
   0x3   :  { %s37_s25 = sshll.u32 %s579_s24, 4  ;;  %s22_s28 = sshll.u32 %s751_s2, 4  ;;  %s38_s25 = int_to_ptr.vmem [resolvable:$true] %s37_s25  ;;  %s23_s28 = int_to_ptr.hbm [resolvable:$true] %s22_s28 }
   0x4   :  { %s580_s29 = smov 128   ;;  %s581_s30 = smov 8  }
   0x5   :  { %43 = dma.hbm_to_vmem [thread:$0]  %s36_s23, 1024, %s38_s25, [#allocation6], %s580_s29, %s580_s29, %s581_s30  }
   0x6   :  { %s582_s7 = smov [#allocation2]   ;;  %s48_s3 = sshll.u32 %s753_s4, 4  ;;  %s49_s3 = int_to_ptr.hbm [resolvable:$true] %s48_s3 }
   0x7   :  { %s24_s8 = sshll.u32 %s582_s7, 4  ;;  %s583_s2 = smov [#allocation7]   ;;  %s25_s8 = int_to_ptr.vmem [resolvable:$true] %s24_s8 }
   0x8   :  { %30 = dma.hbm_to_vmem [thread:$0]  %s23_s28, 768, %s25_s8, [#allocation3], %s580_s29, %s580_s29, %s581_s30  }
   0x9   :  { %s50_s11 = sshll.u32 %s583_s2, 4  ;;  %s51_s11 = int_to_ptr.vmem [resolvable:$true] %s50_s11 }
   0xa   :  { %56 = dma.hbm_to_vmem [thread:$0]  %s49_s3, 512, %s51_s11, [#allocation6], %s580_s29, %s580_s29, %s581_s30  }
   0xb   :  { %573 = dma.done.wait [#allocation3], 768  }
   0xc   :  { %574 = vsyncadd [#allocation3], 4294966528 }
   0xd   :  { %575 = dma.done.wait [#allocation6], 1536  }
   0xe   :  { %576 = vsyncadd [#allocation6], 4294965760  ;;  %v642_v0 = vld [vmem:[#allocation7 + $0x18] sm:$0xff]  ;;  %v644_v2 = vld [vmem:[#allocation7 + $0x10] sm:$0xff]  ;;  %vm83_vm0 = vcmask 261120   ;;  %s584_s15 = smov 64  }
   0xf   :  { %v126_v1 = vld [vmem:[#allocation5 + $0x38] sm:$0xff]  ;;  %102 = vmatpush.msra.mxu0 %v642_v0  ;;  %v450_v3 = vpack.i.bf16 %v644_v2, %v642_v0  ;;  %v125_v4 = vld [vmem:[#allocation5 + $0x30] sm:$0xff]  ;;  %v649_v5 = vld [vmem:[#allocation7 + $0x8] sm:$0xff]  ;;  %vm128_vm1 = vcmask 523264   ;;  %v585_v52 = vmov 0   ;;  %s587_s20 = smov 32  }
  0x10   :  { %421 = vmatpush.msra.mxu1 %v126_v1  ;;  %422 = vmatpush.msra.mxu3 %v126_v1  ;;  %v124_v6 = vld [vmem:[#allocation5 + $0x28] sm:$0xff]  ;;  %v651_v7 = vld [vmem:[#allocation7] sm:$0xff]  ;;  %v660_v10 = vld [vmem:[%s750_s1] sm:$0xff]  ;;  %s588_s21 = smov [#allocation8]   ;;  %s397_s25 = sshll.u32 %s755_s6, 4  ;;  %s398_s25 = int_to_ptr.hbm [resolvable:$true] %s397_s25 }
  0x11   :  { %103 = vmatpush.msra.mxu0 %v644_v2  ;;  %v455_v8 = vpack.i.bf16 %v651_v7, %v649_v5  ;;  %v123_v9 = vld [vmem:[#allocation5 + $0x20] sm:$0xff]  ;;  %v122_v11 = vld [vmem:[#allocation5 + $0x18] sm:$0xff]  ;;  %v665_v12 = vld [vmem:[%s754_s5] ss:$0 sm:$0xff]  ;;  %448 = vset.pattern.permute.xlu1 %v585_v52  ;;  %s395_s22 = sshll.u32 %s588_s21, 4  ;;  %s396_s22 = int_to_ptr.vmem [resolvable:$true] %s395_s22 }
  0x12   :  { %423 = vmatpush.msra.mxu1 %v125_v4  ;;  %424 = vmatpush.msra.mxu3 %v125_v4  ;;  %v121_v13 = vld [vmem:[#allocation5 + $0x10] sm:$0xff]  ;;  %v120_v14 = vld [vmem:[#allocation5 + $0x8] sm:$0xff]  ;;  %v119_v15 = vld [vmem:[#allocation5] sm:$0xff] }
  0x13   :  { %104 = vmatpush.msra.mxu0 %v649_v5  ;;  %80 = vrot.lane.b32.xlu0 %v665_v12, %s584_s15  ;;  %v674_v16 = vld [vmem:[%s750_s1 + $0x8] sm:$0xff]  ;;  %v115_v17 = vld [vmem:[#allocation2 + $0x10] sm:$0xff]  ;;  %v117_v18 = vld [vmem:[#allocation2 + $0x20] sm:$0xff] }
  0x14   :  { %425 = vmatpush.msra.mxu1 %v124_v6  ;;  %426 = vmatpush.msra.mxu3 %v124_v6  ;;  %v113_v19 = vld [vmem:[#allocation2] sm:$0xff]  ;;  %v116_v20 = vld [vmem:[#allocation2 + $0x18] sm:$0xff]  ;;  %v118_v21 = vld [vmem:[#allocation2 + $0x28] sm:$0xff] }
  0x15   :  { %105 = vmatpush.msra.mxu0 %v651_v7  ;;  %v114_v22 = vld [vmem:[#allocation2 + $0x8] sm:$0xff]  ;;  %447 = vset.pattern.permute.xlu2 %v585_v52  ;;  %v182_v54 = vld [vmem:[%s749_s0] sm:$0xff] }
  0x16   :  { %427 = vmatpush.msra.mxu1 %v123_v9  ;;  %428 = vmatpush.msra.mxu3 %v123_v9  ;;  %vm204_vm2 = vcmp.gt.s32.totalorder %v182_v54, 1  ;;  %vm192_vm3 = vcmp.gt.s32.totalorder %v182_v54, 0  ;;  %vm216_vm4 = vcmp.gt.s32.totalorder %v182_v54, 2 }
  0x17   :  { %411 = vmatmul.msk.f32.vlgmr.msra.gmra.mxu0 %vm83_vm0, %v660_v10  ;;  %449 = vset.pattern.permute.xlu0 %v585_v52 }
  0x18   :  { %155 = vmatpush.msrb.mxu0 %v126_v1  ;;  %429 = vmatpush.msra.mxu1 %v122_v11 }
  0x19   :  { %430 = vmatpush.msra.mxu3 %v122_v11 }
  0x1a   :  { %156 = vmatpush.msrb.mxu0 %v125_v4  ;;  %431 = vmatpush.msra.mxu1 %v121_v13 }
  0x1b   :  { %432 = vmatpush.msra.mxu3 %v121_v13 }
  0x1c   :  { %157 = vmatpush.msrb.mxu0 %v124_v6  ;;  %433 = vmatpush.msra.mxu1 %v120_v14 }
  0x1d   :  { %434 = vmatpush.msra.mxu3 %v120_v14 }
  0x1e   :  { %158 = vmatpush.msrb.mxu0 %v123_v9  ;;  %435 = vmatpush.msra.mxu1 %v119_v15 }
  0x1f   :  { %436 = vmatpush.msra.mxu3 %v119_v15  ;;  %412 = vmatmul.msk.f32.gmra.mxu0 %vm83_vm0, %v674_v16 }
  0x20   :  { %159 = vmatpush.msrb.mxu0 %v122_v11  ;;  %415 = vmatmul.msk.f32.vlgmr.msra.gmra.mxu1 %vm128_vm1, %v115_v17 }
  0x21   :  { %417 = vmatmul.msk.f32.vlgmr.msra.gmra.mxu3 %vm128_vm1, %v117_v18 }
  0x22   :  { %160 = vmatpush.msrb.mxu0 %v121_v13  ;;  %v183_v13 = vld [vmem:[%s749_s0 + $0x8] sm:$0xff]  ;;  %s586_s0 = smov 96  }
  0x23   :  { %vm193_vm5 = vcmp.gt.s32.totalorder %v183_v13, 0  ;;  %vm205_vm6 = vcmp.gt.s32.totalorder %v183_v13, 1  ;;  %vm217_vm7 = vcmp.gt.s32.totalorder %v183_v13, 2 }
  0x24   :  { %161 = vmatpush.msrb.mxu0 %v120_v14 }
  0x26   :  { %162 = vmatpush.msrb.mxu0 %v119_v15 }
  0x27   :  { %413 = vmatmul.msk.f32.vlgmr.msrb.gmra.mxu0 %vm128_vm1, %v113_v19 }
  0x28   :  { %416 = vmatmul.msk.f32.gmra.mxu1 %vm128_vm1, %v116_v20 }
  0x29   :  { %418 = vmatmul.msk.f32.gmra.mxu3 %vm128_vm1, %v118_v21 }
  0x2f   :  { %414 = vmatmul.msk.f32.gmra.mxu0 %vm128_vm1, %v114_v22  ;;  %vm388_vm1 = vcmask 523520  }
  0x85   :  { %v81_v24 = vpop.permute.xlu0 %80 }
  0x94   :  { %v107_v23 = vpop.f32.mrf.mxu0 }
  0x95   :  { %v108_v27 = vadd.f32 %v107_v23, %v81_v24 }
  0x9c   :  { %v110_v25 = vpop.f32.mrf.mxu0 }
  0x9d   :  { %v170_v26 = vpop.f32.mrf.mxu1  ;;  %v111_v41 = vadd.f32 %v110_v25, %v81_v24 }
  0x9e   :  { %v685_v28 = vadd.f32 %v665_v12, %v170_v26 }
  0xa0   :  { %v196_v29 = vmul.f32 %v685_v28, %v108_v27 }
  0xa2   :  { %v198_v30 = vsel %vm83_vm0, %v196_v29, 0.0 }
  0xa3   :  { %199 = vadd.xlane.f32.xlu1 %v198_v30 }
  0xa4   :  { %v176_v31 = vpop.f32.mrf.mxu3  ;;  %v164_v32 = vpop.f32.mrf.mxu0 }
  0xa5   :  { %v690_v33 = vadd.f32 %v665_v12, %v176_v31  ;;  %v693_v34 = vadd.f32 %v665_v12, %v164_v32  ;;  %v173_v44 = vpop.f32.mrf.mxu1 }
  0xa6   :  { %v708_v47 = vadd.f32 %v665_v12, %v173_v44 }
  0xa7   :  { %v208_v35 = vmul.f32 %v690_v33, %v108_v27  ;;  %v184_v36 = vmul.f32 %v693_v34, %v108_v27 }
  0xa8   :  { %v197_v50 = vmul.f32 %v708_v47, %v111_v41 }
  0xa9   :  { %v186_v37 = vsel %vm83_vm0, %v184_v36, 0.0  ;;  %v210_v38 = vsel %vm83_vm0, %v208_v35, 0.0 }
  0xaa   :  { %187 = vadd.xlane.f32.xlu0 %v186_v37  ;;  %v201_v51 = vsel %vm83_vm0, %v197_v50, 0.0 }
  0xab   :  { %211 = vadd.xlane.f32.xlu1 %v210_v38 }
  0xac   :  { %v179_v39 = vpop.f32.mrf.mxu3  ;;  %v167_v40 = vpop.f32.mrf.mxu0 }
  0xad   :  { %v700_v42 = vadd.f32 %v665_v12, %v179_v39  ;;  %v703_v43 = vadd.f32 %v665_v12, %v167_v40 }
  0xaf   :  { %v185_v45 = vmul.f32 %v703_v43, %v111_v41  ;;  %v209_v46 = vmul.f32 %v700_v42, %v111_v41 }
  0xb1   :  { %v189_v48 = vsel %vm83_vm0, %v185_v45, 0.0  ;;  %v213_v49 = vsel %vm83_vm0, %v209_v46, 0.0 }
  0xb2   :  { %190 = vadd.xlane.f32.xlu2 %v189_v48 }
  0xb3   :  { %214 = vadd.xlane.f32.xlu1 %v213_v49 }
  0xba   :  { %202 = vadd.xlane.f32.xlu2 %v201_v51 }
 0x116   :  { %v200_v53 = vpop.xlane.xlu1 %199 }
 0x117   :  { %v206_v56 = vsel %vm204_vm2, %v200_v53, -1e+30 }
 0x11d   :  { %v188_v55 = vpop.xlane.xlu0 %187 }
 0x11e   :  { %v212_v57 = vpop.xlane.xlu1 %211  ;;  %v194_v58 = vsel %vm192_vm3, %v188_v55, -1e+30 }
 0x11f   :  { %v220_v59 = vmax.f32 %v194_v58, %v206_v56  ;;  %v218_v60 = vsel %vm216_vm4, %v212_v57, -1e+30 }
 0x121   :  { %v222_v61 = vmax.f32 %v220_v59, %v218_v60 }
 0x123   :  { %v224_v62 = vsub.f32 %v194_v58, %v222_v61  ;;  %v230_v63 = vsub.f32 %v206_v56, %v222_v61  ;;  %v236_v1 = vsub.f32 %v218_v60, %v222_v61 }
 0x125   :  { %v226_v4 = vmul.f32 1.442695, %v224_v62  ;;  %v232_v6 = vmul.f32 1.442695, %v230_v63  ;;  %v191_v9 = vpop.xlane.xlu2 %190  ;;  %v238_v11 = vmul.f32 1.442695, %v236_v1 }
 0x126   :  { %v215_v15 = vpop.xlane.xlu1 %214  ;;  %v195_v19 = vsel %vm193_vm5, %v191_v9, -1e+30 }
 0x127   :  { %461 = vpow2.f32 %v226_v4  ;;  %v219_v24 = vsel %vm217_vm7, %v215_v15, -1e+30 }
 0x128   :  { %463 = vpow2.f32 %v232_v6 }
 0x129   :  { %465 = vpow2.f32 %v238_v11 }
 0x12d   :  { %v462_v14 = vpop.eup %461  ;;  %v203_v17 = vpop.xlane.xlu2 %202 }
 0x12e   :  { %v464_v18 = vpop.eup %463  ;;  %v207_v20 = vsel %vm205_vm6, %v203_v17, -1e+30  ;;  %278 = vperm.xlu2 %447, %v462_v14  }
 0x12f   :  { %v242_v21 = vadd.f32 %v464_v18, %v462_v14  ;;  %v221_v22 = vmax.f32 %v195_v19, %v207_v20  ;;  %290 = vperm.xlu1 %448, %v464_v18   ;;  %v466_v23 = vpop.eup %465 }
 0x131   :  { %v244_v25 = vadd.f32 %v466_v23, %v242_v21  ;;  %v223_v26 = vmax.f32 %v221_v22, %v219_v24 }
 0x133   :  { %467 = vrcp.f32 %v244_v25  ;;  %v225_v27 = vsub.f32 %v195_v19, %v223_v26  ;;  %v231_v29 = vsub.f32 %v207_v20, %v223_v26  ;;  %v237_v30 = vsub.f32 %v219_v24, %v223_v26 }
 0x134   :  { %v257_v40 = vand.u32 2147483648, %v244_v25  ;;  %v255_v45 = vand.u32 2147483647, %v244_v25  ;;  %vm251_vm9 = vweird.f32 %v244_v25 }
 0x135   :  { %v228_v31 = vmul.f32 1.442695, %v225_v27  ;;  %v234_v32 = vmul.f32 1.442695, %v231_v29  ;;  %v240_v35 = vmul.f32 1.442695, %v237_v30 }
 0x136   :  { %304 = vperm.xlu2 %447, %v466_v23   ;;  %v258_v51 = vor.u32 1.1754944e-38, %v257_v40  ;;  %vm256_vm11 = vcmp.eq.f32.partialorder %v255_v45, 8.507059e+37 }
 0x137   :  { %469 = vpow2.f32 %v228_v31 }
 0x138   :  { %471 = vpow2.f32 %v234_v32 }
 0x139   :  { %v468_v36 = vpop.eup %467  ;;  %473 = vpow2.f32 %v240_v35 }
 0x13a   :  { %v247_v37 = vmul.f32 %v468_v36, %v244_v25  ;;  %vm252_vm8 = vweird.f32 %v468_v36 }
 0x13b   :  { %vm253_vm10 = vmor %vm251_vm9, %vm252_vm8 }
 0x13c   :  { %v248_v38 = vsub.f32 1.0, %v247_v37 }
 0x13d   :  { %v470_v39 = vpop.eup %469 }
 0x13e   :  { %v472_v41 = vpop.eup %471  ;;  %283 = vperm.xlu1 %448, %v470_v39   ;;  %v249_v44 = vmul.f32 %v468_v36, %v248_v38 }
 0x13f   :  { %v243_v46 = vadd.f32 %v472_v41, %v470_v39  ;;  %295 = vperm.xlu0 %449, %v472_v41   ;;  %v474_v48 = vpop.eup %473 }
 0x140   :  { %v250_v49 = vadd.f32 %v468_v36, %v249_v44 }
 0x141   :  { %v245_v50 = vadd.f32 %v474_v48, %v243_v46 }
 0x142   :  { %v254_v52 = vsel %vm253_vm10, %v468_v36, %v250_v49 }
 0x143   :  { %475 = vrcp.f32 %v245_v50  ;;  %v259_v53 = vsel %vm256_vm11, %v258_v51, %v254_v52  ;;  %v272_v57 = vand.u32 2147483648, %v245_v50  ;;  %v270_v59 = vand.u32 2147483647, %v245_v50 }
 0x144   :  { %318 = vperm.xlu2 %447, %v259_v53   ;;  %vm266_vm13 = vweird.f32 %v245_v50 }
 0x145   :  { %v273_v61 = vor.u32 1.1754944e-38, %v272_v57  ;;  %vm271_vm15 = vcmp.eq.f32.partialorder %v270_v59, 8.507059e+37 }
 0x149   :  { %v476_v54 = vpop.eup %475 }
 0x14a   :  { %v262_v55 = vmul.f32 %v476_v54, %v245_v50  ;;  %vm267_vm12 = vweird.f32 %v476_v54 }
 0x14b   :  { %vm268_vm14 = vmor %vm266_vm13, %vm267_vm12 }
 0x14c   :  { %309 = vperm.xlu2 %447, %v474_v48   ;;  %v263_v56 = vsub.f32 1.0, %v262_v55 }
 0x14e   :  { %v264_v58 = vmul.f32 %v476_v54, %v263_v56 }
 0x150   :  { %v265_v60 = vadd.f32 %v476_v54, %v264_v58 }
 0x152   :  { %v269_v62 = vsel %vm268_vm14, %v476_v54, %v265_v60 }
 0x153   :  { %v274_v63 = vsel %vm271_vm15, %v273_v61, %v269_v62 }
 0x154   :  { %323 = vperm.xlu1 %448, %v274_v63   ;;  %451 = vrot.lane.b32.xlu2 %v450_v3, %s586_s0 }
 0x15c   :  { %456 = vrot.lane.b32.xlu1 %v455_v8, %s586_s0 }
 0x188   :  { %v279_v1 = vpop.permute.xlu2 %278 }
 0x189   :  { %v286_v11 = vmul.f32 %v279_v1, %v693_v34 }
 0x190   :  { %v305_v4 = vpop.permute.xlu2 %304 }
 0x191   :  { %v312_v14 = vmul.f32 %v305_v4, %v690_v33 }
 0x19e   :  { %v319_v6 = vpop.permute.xlu2 %318 }
 0x1a1   :  { %v291_v9 = vpop.permute.xlu1 %290 }
 0x1a2   :  { %v298_v13 = vmul.f32 %v291_v9, %v685_v28 }
 0x1a4   :  { %v300_v15 = vadd.f32 %v298_v13, %v286_v11 }
 0x1a6   :  { %v314_v17 = vadd.f32 %v312_v14, %v300_v15  ;;  %v310_v18 = vpop.permute.xlu2 %309 }
 0x1a7   :  { %v313_v19 = vmul.f32 %v310_v18, %v700_v42 }
 0x1a8   :  { %v326_v0 = vmul.f32 %v319_v6, %v314_v17 }
 0x1aa   :  { %330 = vrot.lane.b32.xlu2 %v326_v0, %s586_s0 }
 0x1ae   :  { %v452_v2 = vpop.permute.xlu2 %451 }
 0x1af   :  { %v453_v3 = vunpack.i.l.bf16 %v452_v2  ;;  %v454_v5 = vunpack.i.h.bf16 %v452_v2 }
 0x1b0   :  { %v284_v7 = vpop.permute.xlu1 %283 }
 0x1b1   :  { %369 = vmatpush.msra.mxu2 %v453_v3  ;;  %v296_v8 = vpop.permute.xlu0 %295  ;;  %v287_v28 = vmul.f32 %v284_v7, %v703_v43 }
 0x1b2   :  { %350 = vrot.lane.b32.xlu2 %v665_v12, %s587_s20  ;;  %v299_v33 = vmul.f32 %v296_v8, %v708_v47 }
 0x1b3   :  { %370 = vmatpush.msra.mxu2 %v454_v5 }
 0x1b4   :  { %v301_v34 = vadd.f32 %v299_v33, %v287_v28 }
 0x1b6   :  { %v315_v20 = vadd.f32 %v313_v19, %v301_v34 }
 0x1ba   :  { %384 = vrot.lane.b32.xlu2 %v674_v16, %s587_s20 }
 0x1c6   :  { %v324_v21 = vpop.permute.xlu1 %323 }
 0x1c7   :  { %v327_v22 = vmul.f32 %v324_v21, %v315_v20 }
 0x1c9   :  { %332 = vrot.lane.b32.xlu1 %v327_v22, %s586_s0 }
 0x1ce   :  { %v457_v23 = vpop.permute.xlu1 %456 }
 0x1cf   :  { %v458_v24 = vunpack.i.l.bf16 %v457_v23  ;;  %v459_v12 = vunpack.i.h.bf16 %v457_v23 }
 0x1d1   :  { %371 = vmatpush.msra.mxu2 %v458_v24  ;;  %382 = vrot.lane.b32.xlu1 %v660_v10, %s587_s20 }
 0x1d3   :  { %372 = vmatpush.msra.mxu2 %v459_v12 }
 0x204   :  { %v331_v16 = vpop.permute.xlu2 %330 }
 0x205   :  { %419 = vmatmul.msk.f32.vlgmr.msra.gmra.mxu2 %vm83_vm0, %v331_v16 }
 0x20c   :  { %v351_v47 = vpop.permute.xlu2 %350 }
 0x214   :  { %v385_v29 = vpop.permute.xlu2 %384 }
 0x23b   :  { %v333_v43 = vpop.permute.xlu1 %332 }
 0x23c   :  { %420 = vmatmul.msk.f32.gmra.mxu2 %vm83_vm0, %v333_v43 }
 0x243   :  { %v383_v26 = vpop.permute.xlu1 %382 }
 0x288   :  { %v374_v42 = vpop.f32.mrf.mxu2 }
 0x289   :  { %v375_v25 = vadd.f32 %v374_v42, %v351_v47 }
 0x28b   :  { %380 = vst.msk [vmem:[#allocation8] sm:$0xff] %vm83_vm0, %v375_v25 }
 0x28c   :  { %389 = vst.msk [vmem:[#allocation8] sm:$0xff] %vm388_vm1, %v383_v26 }
 0x2bf   :  { %v377_v10 = vpop.f32.mrf.mxu2 }
 0x2c0   :  { %v378_v27 = vadd.f32 %v377_v10, %v351_v47 }
 0x2c2   :  { %381 = vst.msk [vmem:[#allocation8 + $0x8] sm:$0xff] %vm83_vm0, %v378_v27 }
 0x2c3   :  { %390 = vst.msk [vmem:[#allocation8 + $0x8] sm:$0xff] %vm388_vm1, %v385_v29 }
 0x2c4   :  { %403 = dma.vmem_to_hbm [thread:$0]  %s396_s22, 256, %s398_s25, [#allocation4], %s580_s29, %s580_s29, %s581_s30  }
 0x2c5   :  { %577 = dma.done.wait [#allocation4], 256  }
 0x2c6   :  { %578 = vsyncadd [#allocation4], 4294967040 }
 0x2c7   :  { %408 = vsyncpa [#allocation3], 1 }
 0x2c8   :  { %409 = vsyncpa [#allocation6], 1 }
 0x2c9   :  { %410 = vsyncpa [#allocation4], 1 }

</bundles_post_ra>
